<compile_context>
chip_gen: v7x
topology: tpu7x:2x2x1
jax: 0.10.0
libtpu: 0.0.40
codegen_flags: <defaults>
</compile_context>

<pallas_src>
import functools
import math

import jax
import jax.numpy as jnp
from jax.experimental import pallas as pl
from jax.experimental.pallas import tpu as pltpu


# ---------------------------------------------------------------------------
# Kernels (operate on row-packed "slab" tiles)
# ---------------------------------------------------------------------------
def _mlp_slab_kernel(x_ref, w1_ref, b1_ref, w2_ref, b2_ref, o_ref):
    """fc_final(relu(fc1(x))) fused on one row-packed tile.

    Weights / biases use constant index_maps so they stay VMEM-resident across
    all grid steps.  MXU runs with bf16 operands + f32 accumulation; biases
    and ReLU stay in f32.
    """
    x = x_ref[...].astype(w1_ref.dtype)          # in-kernel cast (no HBM pass)
    h = jnp.dot(x, w1_ref[...], preferred_element_type=jnp.float32) + b1_ref[...]
    h = jnp.maximum(h, 0.0)                      # ReLU in f32
    o = jnp.dot(h.astype(w2_ref.dtype), w2_ref[...],
                preferred_element_type=jnp.float32) + b2_ref[...]
    o_ref[...] = o.astype(o_ref.dtype)


def _gencode_slab_kernel(x_ref, g_ref, o_ref):
    """x @ G (the use_g_encode branch), row-packed."""
    x = x_ref[...].astype(g_ref.dtype)
    o_ref[...] = jnp.dot(x, g_ref[...],
                         preferred_element_type=jnp.float32).astype(o_ref.dtype)


# ---------------------------------------------------------------------------
# Layout / tiling helpers (wrapper-side plumbing only)
# ---------------------------------------------------------------------------
_MAX_TILE_SLAB_ROWS = 2048            # review: 2048-4096; VMEM-budget capped below
_TILE_VMEM_BUDGET = 8 * 1024 * 1024   # bytes for ONE (input+output) tile copy
_MIN_GRID_STEPS = 4                   # keep >=4 grid steps when possible (v7x 2 TCs)


def _flatten(x):
    """Mimic the `x.dim() == 3 -> reshape(T*B, -1)` logic of the module."""
    if x.ndim == 3:
        T, B, _ = x.shape
        return x.reshape(T * B, -1)
    return x


def _round_up(v, m):
    return ((v + m - 1) // m) * m


def _choose_pack(c, nt, weight_dims, max_weight_bytes=8 * 1024 * 1024):
    """Rows packed per slab row.

    Prefer pack such that both pack*c (input lanes) and pack*nt (output lanes)
    are multiples of 128 -> full-width vld/vst and dense HBM<->VMEM DMA.  Fall
    back to output-only lane density, then 1, if the block-diagonal weights
    would grow too large to stay VMEM-resident."""
    def lanes(d):
        return 128 // math.gcd(d, 128)

    both = lanes(c) * lanes(nt) // math.gcd(lanes(c), lanes(nt))
    for p in (both, lanes(nt), 1):
        wbytes = sum(p * p * din * dout * 2 for din, dout in weight_dims)  # bf16
        if wbytes <= max_weight_bytes:
            return p
    return 1


def _block_diag(w, pack):
    """[in, out] -> block-diagonal [pack*in, pack*out] (built once, tiny)."""
    din, dout = w.shape
    eye = jnp.eye(pack, dtype=w.dtype)
    return jnp.einsum("pq,io->piqo", eye, w).reshape(pack * din, pack * dout)


def _choose_tile_rows(s_pad, in_row_bytes, out_row_bytes):
    """Slab rows per grid step: as big as the VMEM budget allows, but capped
    so the 1-D "parallel" grid keeps >= _MIN_GRID_STEPS steps when there is
    enough work (lets v7x shard across both TensorCores)."""
    per_row = max(in_row_bytes + out_row_bytes, 1)
    vmem_cap = max(8, (_TILE_VMEM_BUDGET // per_row) // 8 * 8)
    want = _round_up(pl.cdiv(s_pad, _MIN_GRID_STEPS), 8)
    tms = min(_MAX_TILE_SLAB_ROWS, vmem_cap, want, s_pad)
    return max(8, tms)


def _pad_and_slab(xf, pack):
    """Pad rows only to a multiple of 8*pack (no pad at all in the common
    aligned case) and view x as [slab_rows, pack*C] — a free, contiguous
    reshape.  Ragged last grid blocks are handled by Pallas (cdiv grid)."""
    n, c = xf.shape
    n_pad = _round_up(n, 8 * pack)
    if n_pad != n:
        xf = jnp.pad(xf, ((0, n_pad - n), (0, 0)))
    s_pad = n_pad // pack
    return xf.reshape(s_pad, pack * c), s_pad


def _compiler_params():
    return pltpu.CompilerParams(
        dimension_semantics=("parallel",),      # megacore / v7x 2-TC sharding
        vmem_limit_bytes=32 * 1024 * 1024,       # <= 48 MiB: safe on v5e..v7x
    )


# ---------------------------------------------------------------------------
# One-time parameter prep (hoisted out of the per-call jit)
# ---------------------------------------------------------------------------
def prepare_mlp_params(w1, b1, w2, b2, *, compute_dtype=jnp.bfloat16, pack=None):
    """Block-diagonal row-packed weights in the MXU compute dtype + tiled f32
    biases.  Call once; reuse across forward calls."""
    w1 = jnp.asarray(w1, jnp.float32)
    w2 = jnp.asarray(w2, jnp.float32)
    c, nh = w1.shape
    nt = w2.shape[1]
    if pack is None:
        pack = _choose_pack(c, nt, [(c, nh), (nh, nt)])
    w1b = _block_diag(w1, pack).astype(compute_dtype)              # (pack*c,  pack*nh)
    w2b = _block_diag(w2, pack).astype(compute_dtype)              # (pack*nh, pack*nt)
    b1b = jnp.tile(jnp.asarray(b1, jnp.float32).reshape(1, -1), (1, pack))
    b2b = jnp.tile(jnp.asarray(b2, jnp.float32).reshape(1, -1), (1, pack))
    return w1b, b1b, w2b, b2b


def prepare_g_params(G, *, compute_dtype=jnp.bfloat16, pack=None):
    G = jnp.asarray(G, jnp.float32)
    c, nt = G.shape
    if pack is None:
        pack = _choose_pack(c, nt, [(c, nt)])
    return (_block_diag(G, pack).astype(compute_dtype),)


# ---------------------------------------------------------------------------
# Forward wrappers
# ---------------------------------------------------------------------------
@functools.partial(jax.jit, static_argnames=("out_dtype",))
def xencode_mlp_forward(x, w1b, b1b, w2b, b2b, out_dtype=jnp.float32):
    """use_g_encode == False path: fc_final(relu(fc1(x)))."""
    xf = _flatten(x)
    n, c = xf.shape
    pack = w1b.shape[0] // c
    nt = w2b.shape[1] // pack

    x_slab, s_pad = _pad_and_slab(xf, pack)
    tms = _choose_tile_rows(
        s_pad,
        pack * c * x_slab.dtype.itemsize,
        pack * nt * jnp.dtype(out_dtype).itemsize,
    )

    # Note: weights could use pipeline_mode=pl.Buffered(1) (single-buffer the
    # never-changing blocks); skipped here to keep compilation robust.
    out_slab = pl.pallas_call(
        _mlp_slab_kernel,
        out_shape=jax.ShapeDtypeStruct((s_pad, pack * nt), out_dtype),
        grid=(pl.cdiv(s_pad, tms),),
        in_specs=[
            pl.BlockSpec((tms, pack * c), lambda i: (i, 0)),   # streamed row tiles
            pl.BlockSpec(w1b.shape, lambda i: (0, 0)),          # VMEM-resident
            pl.BlockSpec(b1b.shape, lambda i: (0, 0)),
            pl.BlockSpec(w2b.shape, lambda i: (0, 0)),
            pl.BlockSpec(b2b.shape, lambda i: (0, 0)),
        ],
        out_specs=pl.BlockSpec((tms, pack * nt), lambda i: (i, 0)),
        compiler_params=_compiler_params(),
    )(x_slab, w1b, b1b, w2b, b2b)

    # Free (contiguous) reshape back to [N, nt]; drop padded rows.
    return out_slab.reshape(s_pad * pack, nt)[:n]


@functools.partial(jax.jit, static_argnames=("out_dtype",))
def xencode_gencode_forward(x, gb, out_dtype=jnp.float32):
    """use_g_encode == True path: x @ G."""
    xf = _flatten(x)
    n, c = xf.shape
    pack = gb.shape[0] // c
    nt = gb.shape[1] // pack

    x_slab, s_pad = _pad_and_slab(xf, pack)
    tms = _choose_tile_rows(
        s_pad,
        pack * c * x_slab.dtype.itemsize,
        pack * nt * jnp.dtype(out_dtype).itemsize,
    )

    out_slab = pl.pallas_call(
        _gencode_slab_kernel,
        out_shape=jax.ShapeDtypeStruct((s_pad, pack * nt), out_dtype),
        grid=(pl.cdiv(s_pad, tms),),
        in_specs=[
            pl.BlockSpec((tms, pack * c), lambda i: (i, 0)),
            pl.BlockSpec(gb.shape, lambda i: (0, 0)),            # VMEM-resident
        ],
        out_specs=pl.BlockSpec((tms, pack * nt), lambda i: (i, 0)),
        compiler_params=_compiler_params(),
    )(x_slab, gb)

    return out_slab.reshape(s_pad * pack, nt)[:n]


# ---------------------------------------------------------------------------
# Deterministic parameter init (matches nn.Linear shapes / uniform scheme)
# ---------------------------------------------------------------------------
def init_params(key, num_domain, nh, nt):
    k1, k2, k3, k4, k5 = jax.random.split(key, 5)
    lim1 = 1.0 / jnp.sqrt(num_domain)
    lim2 = 1.0 / jnp.sqrt(nh)
    w1 = jax.random.uniform(k1, (num_domain, nh), jnp.float32, -lim1, lim1)
    b1 = jax.random.uniform(k2, (1, nh), jnp.float32, -lim1, lim1)
    w2 = jax.random.uniform(k3, (nh, nt), jnp.float32, -lim2, lim2)
    b2 = jax.random.uniform(k4, (1, nt), jnp.float32, -lim2, lim2)
    # G table for the use_g_encode branch (synthetic deterministic encode).
    G = jax.random.normal(k5, (num_domain, nt), jnp.float32)
    return w1, b1, w2, b2, G


# ---------------------------------------------------------------------------
if __name__ == "__main__":
    # Small shapes consistent with the module: T=8, B=2, C=num_domain=4,
    # nh=32 hidden units, nt=8 output encoding size.
    T, B, num_domain, nh, nt = 8, 2, 4, 32, 8

    key = jax.random.PRNGKey(0)
    kx, kp = jax.random.split(key)
    x = jax.random.normal(kx, (T, B, num_domain), jnp.float32)
    w1, b1, w2, b2, G = init_params(kp, num_domain, nh, nt)

    # One-time prep (block-diag packing + bf16 cast) hoisted out of the jit.
    mlp_params = prepare_mlp_params(w1, b1, w2, b2)
    g_params = prepare_g_params(G)

    xf = x.reshape(T * B, num_domain)
    bf = lambda a: a.astype(jnp.bfloat16).astype(jnp.float32)
    hi = jax.lax.Precision.HIGHEST

    # --- use_g_encode = False (MLP branch) ---
    out_mlp = jax.block_until_ready(xencode_mlp_forward(x, *mlp_params))
    # Reference emulating bf16 MXU operands with f32 accumulation.
    h_ref = jnp.maximum(jnp.dot(bf(xf), bf(w1), precision=hi) + b1, 0.0)
    ref_mlp = jnp.dot(bf(h_ref), bf(w2), precision=hi) + b2
    assert out_mlp.shape == (T * B, nt)
    assert jnp.allclose(out_mlp, ref_mlp, atol=1e-2, rtol=1e-2)

    # --- use_g_encode = True (matmul with fixed G) ---
    out_g = jax.block_until_ready(xencode_gencode_forward(x, *g_params))
    ref_g = jnp.dot(bf(xf), bf(G), precision=hi)
    assert out_g.shape == (T * B, nt)
    assert jnp.allclose(out_g, ref_g, atol=1e-2, rtol=1e-2)

    print("KERNEL_OK")
</pallas_src>

<mosaic_0001>
module attributes {stable_mosaic.version = 11 : i64} {
  func.func @_mlp_slab_kernel(%arg0: i32, %arg1: memref<8x128xf32, #tpu.memory_space<vmem>>, %arg2: memref<128x1024xbf16, #tpu.memory_space<vmem>>, %arg3: memref<1x1024xf32, #tpu.memory_space<vmem>>, %arg4: memref<1024x256xbf16, #tpu.memory_space<vmem>>, %arg5: memref<1x256xf32, #tpu.memory_space<vmem>>, %arg6: memref<8x256xf32, #tpu.memory_space<vmem>>) attributes {dimension_semantics = [#tpu.dimension_semantics<parallel>], iteration_bounds = array<i64: 1>, scalar_prefetch = 0 : i64, scratch_operands = 0 : i64, tpu.core_type = #tpu.core_type<tc>, window_params = [{transform_indices = @transform_0, window_bounds = array<i64: 8, 128>}, {pipeline_mode = #tpu.pipeline_mode<synchronous>, transform_indices = @transform_1, window_bounds = array<i64: 128, 1024>}, {pipeline_mode = #tpu.pipeline_mode<synchronous>, transform_indices = @transform_2, window_bounds = array<i64: 1, 1024>}, {pipeline_mode = #tpu.pipeline_mode<synchronous>, transform_indices = @transform_3, window_bounds = array<i64: 1024, 256>}, {pipeline_mode = #tpu.pipeline_mode<synchronous>, transform_indices = @transform_4, window_bounds = array<i64: 1, 256>}, {transform_indices = @transform_5, window_bounds = array<i64: 8, 256>}]} {
    %c0 = arith.constant 0 : index
    %c0_0 = arith.constant 0 : index
    %0 = vector.load %arg1[%c0, %c0_0] : memref<8x128xf32, #tpu.memory_space<vmem>>, vector<8x128xf32>
    %1 = arith.truncf %0 : vector<8x128xf32> to vector<8x128xbf16>
    %c0_1 = arith.constant 0 : index
    %c0_2 = arith.constant 0 : index
    %2 = vector.load %arg2[%c0_1, %c0_2] : memref<128x1024xbf16, #tpu.memory_space<vmem>>, vector<128x1024xbf16>
    %cst = arith.constant dense<0.000000e+00> : vector<8x1024xf32>
    %3 = tpu.matmul %1, %2, %cst {dimension_numbers = #tpu.dot_dimension_numbers<[1], [0], [0], [1], [0, 0, 1, 1], [], []>} : vector<8x128xbf16>, vector<128x1024xbf16>, vector<8x1024xf32> -> vector<8x1024xf32>
    %c0_3 = arith.constant 0 : index
    %c0_4 = arith.constant 0 : index
    %4 = vector.load %arg3[%c0_3, %c0_4] : memref<1x1024xf32, #tpu.memory_space<vmem>>, vector<1x1024xf32>
    %5 = vector.broadcast %4 : vector<1x1024xf32> to vector<8x1024xf32>
    %6 = arith.addf %3, %5 : vector<8x1024xf32>
    %cst_5 = arith.constant 0.000000e+00 : f32
    %7 = vector.broadcast %cst_5 : f32 to vector<8x1024xf32>
    %8 = arith.maximumf %6, %7 : vector<8x1024xf32>
    %9 = arith.truncf %8 : vector<8x1024xf32> to vector<8x1024xbf16>
    %c0_6 = arith.constant 0 : index
    %c0_7 = arith.constant 0 : index
    %10 = vector.load %arg4[%c0_6, %c0_7] : memref<1024x256xbf16, #tpu.memory_space<vmem>>, vector<1024x256xbf16>
    %cst_8 = arith.constant dense<0.000000e+00> : vector<8x256xf32>
    %11 = tpu.matmul %9, %10, %cst_8 {dimension_numbers = #tpu.dot_dimension_numbers<[1], [0], [0], [1], [0, 0, 1, 1], [], []>} : vector<8x1024xbf16>, vector<1024x256xbf16>, vector<8x256xf32> -> vector<8x256xf32>
    %c0_9 = arith.constant 0 : index
    %c0_10 = arith.constant 0 : index
    %12 = vector.load %arg5[%c0_9, %c0_10] : memref<1x256xf32, #tpu.memory_space<vmem>>, vector<1x256xf32>
    %13 = vector.broadcast %12 : vector<1x256xf32> to vector<8x256xf32>
    %14 = arith.addf %11, %13 : vector<8x256xf32>
    %c0_11 = arith.constant 0 : index
    %c0_12 = arith.constant 0 : index
    %15 = vector.load %arg6[%c0_11, %c0_12] : memref<8x256xf32, #tpu.memory_space<vmem>>, vector<8x256xf32>
    tpu.vector_store %arg6[%c0_11, %c0_12], %14 {strides = array<i32>} : memref<8x256xf32, #tpu.memory_space<vmem>>, vector<8x256xf32>,
    return
  }
  func.func @transform_0(%arg0: i32) -> (i32, i32) {
    %c0_i32 = arith.constant 0 : i32
    %c0_i32_0 = arith.constant 0 : i32
    return %arg0, %c0_i32 : i32, i32
  }
  func.func @transform_1(%arg0: i32) -> (i32, i32) {
    %c0_i32 = arith.constant 0 : i32
    %c0_i32_0 = arith.constant 0 : i32
    %c0_i32_1 = arith.constant 0 : i32
    return %c0_i32, %c0_i32_0 : i32, i32
  }
  func.func @transform_2(%arg0: i32) -> (i32, i32) {
    %c0_i32 = arith.constant 0 : i32
    %c0_i32_0 = arith.constant 0 : i32
    %c0_i32_1 = arith.constant 0 : i32
    return %c0_i32, %c0_i32_0 : i32, i32
  }
  func.func @transform_3(%arg0: i32) -> (i32, i32) {
    %c0_i32 = arith.constant 0 : i32
    %c0_i32_0 = arith.constant 0 : i32
    %c0_i32_1 = arith.constant 0 : i32
    return %c0_i32, %c0_i32_0 : i32, i32
  }
  func.func @transform_4(%arg0: i32) -> (i32, i32) {
    %c0_i32 = arith.constant 0 : i32
    %c0_i32_0 = arith.constant 0 : i32
    %c0_i32_1 = arith.constant 0 : i32
    return %c0_i32, %c0_i32_0 : i32, i32
  }
  func.func @transform_5(%arg0: i32) -> (i32, i32) {
    %c0_i32 = arith.constant 0 : i32
    %c0_i32_0 = arith.constant 0 : i32
    return %arg0, %c0_i32 : i32, i32
  }
}

</mosaic_0001>

<bundles_post_ra>
// kernel: xencode_mlp_forward.1
= control target key start
LH: loop header
LB: loop body
LE: loop exit
PB: predicated region body
PF: predicated region fallthrough
CT: control target
= control target key end

     0   :  { %10 = vsyncpa [#allocation3], 0  ;;  %s2018_s18 = smov [#allocation2]   ;;  %s2315_s0 = inlined_call_operand.vmem [shape: f32[8,128], index: 0, kind: input, shape index: {}]   ;;  %s2316_s1 = inlined_call_operand.vmem [shape: bf16[128,1024], index: 1, kind: input, shape index: {}]   ;;  %s2317_s2 = inlined_call_operand.vmem [shape: f32[1,1024], index: 2, kind: input, shape index: {}]   ;;  %s2318_s3 = inlined_call_operand.hbm [shape: bf16[1024,256], index: 3, kind: input, shape index: {}]   ;;  %s2319_s4 = inlined_call_operand.vmem [shape: f32[1,256], index: 4, kind: input, shape index: {}]   ;;  %s2320_s5 = inlined_call_operand.vmem [shape: f32[8,256], index: 5, kind: output, shape index: {}]  }
   0x1   :  { %s22_s19 = sshll.u32 %s2018_s18, 4  ;;  %s1994_s22 = scalar_lea.hbm %s2318_s3, 16384  ;;  %s23_s19 = int_to_ptr.vmem [resolvable:$true] %s22_s19 }
   0x2   :  { %p1995_p0 = scmp.ne.s32.totalorder %s2318_s3, %s1994_s22  ;;  %p1998_p1 = scmp.lt.u32.totalorder %s1994_s22, %s2318_s3 }
   0x4   :  { %p2000_p2 = pnand %p1998_p1, %p1995_p0 }
   0x6   :  { %2003 = shalt.err (!%p2000_p2)
}
   0x7   :  { %s2004_s27 = scalar_lea.vmem %s23_s19, 16384  ;;  %p2009_p4 = scmp.lt.s32.totalorder %s23_s19, %s23_s19 }
   0x8   :  { %p2005_p3 = scmp.ne.s32.totalorder %s23_s19, %s2004_s27  ;;  %p2010_p5 = scmp.lt.s32.totalorder %s2004_s27, %s2004_s27 }
   0xa   :  { %p2011_p6 = por %p2010_p5, %p2009_p4 }
   0xc   :  { %p2012_p7 = pnand %p2011_p6, %p2005_p3 }
   0xe   :  { %2015 = shalt.err (!%p2012_p7)
}
   0xf   :  { %s2019_s28 = smov 128   ;;  %s2020_s29 = smov 8  }
  0x10   :  { %28 = dma.hbm_to_vmem [thread:$0]  %s2318_s3, 16384, %s23_s19, [#allocation3], %s2019_s28, %s2019_s28, %s2020_s29  }
  0x11   :  { %2016 = dma.done.wait [#allocation3], 16384  }
  0x12   :  { %2017 = vsyncadd [#allocation3], 4294950912  ;;  %v2021_v0 = vmov 0   ;;  %v37_v1 = vld [vmem:[%s2316_s1] sm:$0xff]  ;;  %v38_v18 = vld [vmem:[%s2316_s1 + $0x8] sm:$0xff] }
  0x13   :  { %495 = vmatprep.mubr.bf16.mxu0 %v2021_v0  ;;  %536 = vmatprep.mubr.bf16.mxu1 %v2021_v0  ;;  %v41_v2 = vld [vmem:[%s2316_s1 + $0x20] sm:$0xff]  ;;  %v42_v19 = vld [vmem:[%s2316_s1 + $0x28] sm:$0xff]  ;;  %v39_v54 = vld [vmem:[%s2316_s1 + $0x10] sm:$0xff] }
  0x14   :  { %v45_v3 = vld [vmem:[%s2316_s1 + $0x40] sm:$0xff]  ;;  %v1595_v4 = vcombine.high %v37_v1, %v41_v2  ;;  %v1594_v5 = vcombine.low %v37_v1, %v41_v2  ;;  %v1597_v20 = vcombine.high %v38_v18, %v42_v19  ;;  %v1596_v21 = vcombine.low %v38_v18, %v42_v19  ;;  %v46_v22 = vld [vmem:[%s2316_s1 + $0x48] sm:$0xff]  ;;  %v43_v55 = vld [vmem:[%s2316_s1 + $0x30] sm:$0xff] }
  0x15   :  { %v49_v6 = vld [vmem:[%s2316_s1 + $0x60] sm:$0xff]  ;;  %v50_v24 = vld [vmem:[%s2316_s1 + $0x68] sm:$0xff]  ;;  %v1599_v61 = vcombine.high %v39_v54, %v43_v55  ;;  %v47_v62 = vld [vmem:[%s2316_s1 + $0x50] sm:$0xff] }
  0x16   :  { %v1603_v7 = vcombine.high %v45_v3, %v49_v6  ;;  %v53_v8 = vld [vmem:[%s2316_s1 + $0x80] sm:$0xff]  ;;  %463 = vmatprep.subr.bf16.mxu0 %v1595_v4  ;;  %v1602_v10 = vcombine.low %v45_v3, %v49_v6  ;;  %v54_v25 = vld [vmem:[%s2316_s1 + $0x88] sm:$0xff]  ;;  %504 = vmatprep.subr.bf16.mxu1 %v1597_v20  ;;  %v1605_v28 = vcombine.high %v46_v22, %v50_v24  ;;  %v51_v63 = vld [vmem:[%s2316_s1 + $0x70] sm:$0xff] }
  0x17   :  { %v57_v9 = vld [vmem:[%s2316_s1 + $0xa0] sm:$0xff]  ;;  %464 = vmatpush1.bf16.msra.mxu0 %v1594_v5  ;;  %v58_v26 = vld [vmem:[%s2316_s1 + $0xa8] sm:$0xff]  ;;  %505 = vmatpush1.bf16.msra.mxu1 %v1596_v21  ;;  %v1604_v31 = vcombine.low %v46_v22, %v50_v24  ;;  %v1598_v5 = vcombine.low %v39_v54, %v43_v55  ;;  %v48_v20 = vld [vmem:[%s2316_s1 + $0x58] sm:$0xff] }
  0x18   :  { %465 = vmatprep.subr.bf16.mxu0 %v1603_v7  ;;  %v1611_v11 = vcombine.high %v53_v8, %v57_v9  ;;  %v61_v12 = vld [vmem:[%s2316_s1 + $0xc0] sm:$0xff]  ;;  %v1610_v14 = vcombine.low %v53_v8, %v57_v9  ;;  %506 = vmatprep.subr.bf16.mxu1 %v1605_v28  ;;  %v1613_v32 = vcombine.high %v54_v25, %v58_v26  ;;  %v62_v34 = vld [vmem:[%s2316_s1 + $0xc8] sm:$0xff]  ;;  %v55_v8 = vld [vmem:[%s2316_s1 + $0x90] sm:$0xff] }
  0x19   :  { %v65_v13 = vld [vmem:[%s2316_s1 + $0xe0] sm:$0xff]  ;;  %v66_v35 = vld [vmem:[%s2316_s1 + $0xe8] sm:$0xff]  ;;  %v1612_v39 = vcombine.low %v54_v25, %v58_v26  ;;  %v1607_v7 = vcombine.high %v47_v62, %v51_v63  ;;  %v59_v9 = vld [vmem:[%s2316_s1 + $0xb0] sm:$0xff] }
  0x1a   :  { %v1619_v15 = vcombine.high %v61_v12, %v65_v13  ;;  %v69_v16 = vld [vmem:[%s2316_s1 + $0x100] sm:$0xff]  ;;  %v1618_v23 = vcombine.low %v61_v12, %v65_v13  ;;  %v1621_v40 = vcombine.high %v62_v34, %v66_v35  ;;  %v70_v42 = vld [vmem:[%s2316_s1 + $0x108] sm:$0xff]  ;;  %v1620_v47 = vcombine.low %v62_v34, %v66_v35  ;;  %v40_v12 = vld [vmem:[%s2316_s1 + $0x18] sm:$0xff] }
  0x1b   :  { %466 = vmatpush1.bf16.msra.mxu0 %v1602_v10  ;;  %v73_v17 = vld [vmem:[%s2316_s1 + $0x120] sm:$0xff]  ;;  %507 = vmatpush1.bf16.msra.mxu1 %v1604_v31  ;;  %v74_v43 = vld [vmem:[%s2316_s1 + $0x128] sm:$0xff]  ;;  %v1606_v13 = vcombine.low %v47_v62, %v51_v63  ;;  %v1614_v21 = vcombine.low %v55_v8, %v59_v9  ;;  %v52_v22 = vld [vmem:[%s2316_s1 + $0x78] sm:$0xff] }
  0x1c   :  { %467 = vmatprep.subr.bf16.mxu0 %v1611_v11  ;;  %v1627_v27 = vcombine.high %v69_v16, %v73_v17  ;;  %v77_v29 = vld [vmem:[%s2316_s1 + $0x140] sm:$0xff]  ;;  %v1626_v33 = vcombine.low %v69_v16, %v73_v17  ;;  %508 = vmatprep.subr.bf16.mxu1 %v1613_v32  ;;  %v1629_v48 = vcombine.high %v70_v42, %v74_v43  ;;  %v78_v49 = vld [vmem:[%s2316_s1 + $0x148] sm:$0xff]  ;;  %v63_v16 = vld [vmem:[%s2316_s1 + $0xd0] sm:$0xff] }
  0x1d   :  { %v81_v30 = vld [vmem:[%s2316_s1 + $0x160] sm:$0xff]  ;;  %v82_v51 = vld [vmem:[%s2316_s1 + $0x168] sm:$0xff]  ;;  %v1628_v56 = vcombine.low %v70_v42, %v74_v43  ;;  %v67_v17 = vld [vmem:[%s2316_s1 + $0xf0] sm:$0xff]  ;;  %v1608_v34 = vcombine.low %v48_v20, %v52_v22 }
  0x1e   :  { %v1635_v36 = vcombine.high %v77_v29, %v81_v30  ;;  %v85_v37 = vld [vmem:[%s2316_s1 + $0x180] sm:$0xff]  ;;  %v1634_v41 = vcombine.low %v77_v29, %v81_v30  ;;  %v1637_v57 = vcombine.high %v78_v49, %v82_v51  ;;  %v86_v58 = vld [vmem:[%s2316_s1 + $0x188] sm:$0xff]  ;;  %v1636_v1 = vcombine.low %v78_v49, %v82_v51  ;;  %v71_v24 = vld [vmem:[%s2316_s1 + $0x110] sm:$0xff] }
  0x1f   :  { %468 = vmatpush1.bf16.msra.mxu0 %v1610_v14  ;;  %v89_v38 = vld [vmem:[%s2316_s1 + $0x1a0] sm:$0xff]  ;;  %509 = vmatpush1.bf16.msra.mxu1 %v1612_v39  ;;  %v90_v60 = vld [vmem:[%s2316_s1 + $0x1a8] sm:$0xff]  ;;  %v44_v14 = vld [vmem:[%s2316_s1 + $0x38] sm:$0xff]  ;;  %v1622_v29 = vcombine.low %v63_v16, %v67_v17 }
  0x20   :  { %469 = vmatprep.subr.bf16.mxu0 %v1619_v15  ;;  %v1643_v44 = vcombine.high %v85_v37, %v89_v38  ;;  %v93_v45 = vld [vmem:[%s2316_s1 + $0x1c0] sm:$0xff]  ;;  %510 = vmatprep.subr.bf16.mxu1 %v1621_v40  ;;  %v1642_v50 = vcombine.low %v85_v37, %v89_v38  ;;  %v1645_v3 = vcombine.high %v86_v58, %v90_v60  ;;  %v94_v4 = vld [vmem:[%s2316_s1 + $0x1c8] sm:$0xff]  ;;  %v75_v25 = vld [vmem:[%s2316_s1 + $0x130] sm:$0xff] }
  0x21   :  { %v97_v46 = vld [vmem:[%s2316_s1 + $0x1e0] sm:$0xff]  ;;  %v98_v6 = vld [vmem:[%s2316_s1 + $0x1e8] sm:$0xff]  ;;  %v1644_v10 = vcombine.low %v86_v58, %v90_v60  ;;  %v1615_v15 = vcombine.high %v55_v8, %v59_v9  ;;  %v1601_v19 = vcombine.high %v40_v12, %v44_v14  ;;  %v1600_v26 = vcombine.low %v40_v12, %v44_v14  ;;  %v56_v28 = vld [vmem:[%s2316_s1 + $0x98] sm:$0xff] }
  0x22   :  { %v1651_v52 = vcombine.high %v93_v45, %v97_v46  ;;  %v35_v53 = vld [vmem:[%s2315_s0] sm:$0xff]  ;;  %v1650_v59 = vcombine.low %v93_v45, %v97_v46  ;;  %v1653_v11 = vcombine.high %v94_v4, %v98_v6  ;;  %v1652_v18 = vcombine.low %v94_v4, %v98_v6  ;;  %v60_v30 = vld [vmem:[%s2316_s1 + $0xb8] sm:$0xff]  ;;  %v79_v32 = vld [vmem:[%s2316_s1 + $0x150] sm:$0xff] }
  0x23   :  { %470 = vmatpush1.bf16.msra.mxu0 %v1618_v23  ;;  %511 = vmatpush1.bf16.msra.mxu1 %v1620_v47  ;;  %v2171_v2 = vpack.c.bf16 %v35_v53, %v35_v53  ;;  %v1623_v23 = vcombine.high %v63_v16, %v67_v17  ;;  %v1631_v31 = vcombine.high %v71_v24, %v75_v25  ;;  %v87_v37 = vld [vmem:[%s2316_s1 + $0x190] sm:$0xff]  ;;  %v64_v39 = vld [vmem:[%s2316_s1 + $0xd8] sm:$0xff]  ;;  %v1843_v8 = vld [vmem:[#allocation2 + $0x224] ss:$8 sps:$4 sm:$0xff]  }
  0x24   :  { %471 = vmatprep.subr.bf16.mxu0 %v1627_v27  ;;  %512 = vmatprep.subr.bf16.mxu1 %v1629_v48  ;;  %v1609_v27 = vcombine.high %v48_v20, %v52_v22  ;;  %v1617_v35 = vcombine.high %v56_v28, %v60_v30  ;;  %v91_v38 = vld [vmem:[%s2316_s1 + $0x1b0] sm:$0xff]  ;;  %v72_v42 = vld [vmem:[%s2316_s1 + $0x118] sm:$0xff]  ;;  %v1804_v9 = vld [vmem:[#allocation2 + $0x4] ss:$8 sps:$4 sm:$0xff]  }
  0x25   :  { %v76_v43 = vld [vmem:[%s2316_s1 + $0x138] sm:$0xff]  ;;  %v95_v46 = vld [vmem:[%s2316_s1 + $0x1d0] sm:$0xff]  ;;  %v1647_v48 = vcombine.high %v87_v37, %v91_v38  ;;  %v1646_v53 = vcombine.low %v87_v37, %v91_v38  ;;  %v1855_v16 = vld [vmem:[#allocation2 + $0x244] ss:$8 sps:$4 sm:$0xff]  }
  0x26   :  { %v99_v47 = vld [vmem:[%s2316_s1 + $0x1f0] sm:$0xff]  ;;  %v84_v51 = vld [vmem:[%s2316_s1 + $0x178] sm:$0xff]  ;;  %v1632_v55 = vcombine.low %v72_v42, %v76_v43  ;;  %v1838_v37 = vld [vmem:[#allocation2 + $0xa0] ss:$8 sps:$4 sm:$0xff]  }
  0x27   :  { %472 = vmatpush1.bf16.msra.mxu0 %v1626_v33  ;;  %513 = vmatpush1.bf16.msra.mxu1 %v1628_v56  ;;  %v83_v33 = vld [vmem:[%s2316_s1 + $0x170] sm:$0xff]  ;;  %v1655_v54 = vcombine.high %v95_v46, %v99_v47  ;;  %v88_v56 = vld [vmem:[%s2316_s1 + $0x198] sm:$0xff]  ;;  %v1654_v60 = vcombine.low %v95_v46, %v99_v47  ;;  %v1879_v46 = vld [vmem:[#allocation2 + $0x284] ss:$8 sps:$4 sm:$0xff]  }
  0x28   :  { %473 = vmatprep.subr.bf16.mxu0 %v1635_v36  ;;  %514 = vmatprep.subr.bf16.mxu1 %v1637_v57  ;;  %v1630_v36 = vcombine.low %v71_v24, %v75_v25  ;;  %v1639_v40 = vcombine.high %v79_v32, %v83_v33  ;;  %v1638_v45 = vcombine.low %v79_v32, %v83_v33  ;;  %v92_v57 = vld [vmem:[%s2316_s1 + $0x1b8] sm:$0xff]  ;;  %v1814_v25 = vld [vmem:[#allocation2 + $0x40] ss:$8 sps:$4 sm:$0xff]   ;;  %v1828_v32 = vld [vmem:[#allocation2 + $0x84] ss:$8 sps:$4 sm:$0xff]  }
  0x29   :  { %v96_v62 = vld [vmem:[%s2316_s1 + $0x1d8] sm:$0xff]  ;;  %v1826_v33 = vld [vmem:[#allocation2 + $0x80] ss:$8 sps:$4 sm:$0xff]  }
  0x2a   :  { %v100_v63 = vld [vmem:[%s2316_s1 + $0x1f8] sm:$0xff]  ;;  %v1877_v47 = vld [vmem:[#allocation2 + $0x280] ss:$8 sps:$4 sm:$0xff]  }
  0x2b   :  { %474 = vmatpush1.bf16.msra.mxu0 %v1634_v41  ;;  %515 = vmatpush1.bf16.msra.mxu1 %v1636_v1  ;;  %v1616_v41 = vcombine.low %v56_v28, %v60_v30  ;;  %v1829_v1 = vld [vmem:[#allocation2 + $0x200] ss:$8 sps:$4 sm:$0xff]   ;;  %v1837_v4 = vld [vmem:[#allocation2 + $0x214] ss:$8 sps:$4 sm:$0xff]   ;;  %v1835_v6 = vld [vmem:[#allocation2 + $0x210] ss:$8 sps:$4 sm:$0xff]  }
  0x2c   :  { %475 = vmatprep.subr.bf16.mxu0 %v1643_v44  ;;  %516 = vmatprep.subr.bf16.mxu1 %v1645_v3  ;;  %v1649_v3 = vcombine.high %v88_v56, %v92_v57  ;;  %v1849_v12 = vld [vmem:[#allocation2 + $0x234] ss:$8 sps:$4 sm:$0xff]   ;;  %v1805_v17 = vld [vmem:[#allocation2 + $0x10] ss:$8 sps:$4 sm:$0xff]   ;;  %v1822_v28 = vld [vmem:[#allocation2 + $0x64] ss:$8 sps:$4 sm:$0xff]  }
  0x2d   :  { %v1807_v14 = vld [vmem:[#allocation2 + $0x14] ss:$8 sps:$4 sm:$0xff]   ;;  %v1811_v24 = vld [vmem:[#allocation2 + $0x30] ss:$8 sps:$4 sm:$0xff]  }
  0x2e   :  { %v1861_v20 = vld [vmem:[#allocation2 + $0x254] ss:$8 sps:$4 sm:$0xff]  }
  0x2f   :  { %476 = vmatpush1.bf16.msra.mxu0 %v1642_v50  ;;  %517 = vmatpush1.bf16.msra.mxu1 %v1644_v10  ;;  %v80_v50 = vld [vmem:[%s2316_s1 + $0x158] sm:$0xff]  ;;  %v1656_v10 = vcombine.low %v96_v62, %v100_v63 }
  0x30   :  { %477 = vmatprep.subr.bf16.mxu0 %v1651_v52  ;;  %518 = vmatprep.subr.bf16.mxu1 %v1653_v11  ;;  %v1633_v52 = vcombine.high %v72_v42, %v76_v43  ;;  %v1641_v58 = vcombine.high %v80_v50, %v84_v51  ;;  %v1841_v11 = vld [vmem:[#allocation2 + $0x220] ss:$8 sps:$4 sm:$0xff]   ;;  %v1813_v22 = vld [vmem:[#allocation2 + $0x34] ss:$8 sps:$4 sm:$0xff]   ;;  %v1871_v43 = vld [vmem:[#allocation2 + $0x270] ss:$8 sps:$4 sm:$0xff]  }
  0x31   :  { %v1825_v30 = vld [vmem:[#allocation2 + $0x74] ss:$8 sps:$4 sm:$0xff]  }
  0x32   :  { %v1846_v38 = vld [vmem:[#allocation2 + $0xb4] ss:$8 sps:$4 sm:$0xff]  }
  0x33   :  { %478 = vmatpush1.bf16.msra.mxu0 %v1650_v59  ;;  %519 = vmatpush1.bf16.msra.mxu1 %v1652_v18  ;;  %v1831_v59 = vld [vmem:[#allocation2 + $0x204] ss:$8 sps:$4 sm:$0xff]   ;;  %v1873_v42 = vld [vmem:[#allocation2 + $0x274] ss:$8 sps:$4 sm:$0xff]  }
  0x34   :  { %545 = vmatprep.subr.bf16.mxu0 %v1599_v61  ;;  %586 = vmatprep.subr.bf16.mxu1 %v1601_v19  ;;  %v1640_v61 = vcombine.low %v80_v50, %v84_v51  ;;  %v1810_v18 = vld [vmem:[#allocation2 + $0x24] ss:$8 sps:$4 sm:$0xff]   ;;  %v1853_v19 = vld [vmem:[#allocation2 + $0x240] ss:$8 sps:$4 sm:$0xff]   ;;  %v1883_v50 = vld [vmem:[#allocation2 + $0x290] ss:$8 sps:$4 sm:$0xff]  }
  0x35   :  { %v1885_v51 = vld [vmem:[#allocation2 + $0x294] ss:$8 sps:$4 sm:$0xff]  }
  0x36   :  { %496 = vmatmul.mubr.bf16.vlgmr.msra.gmra.mrb[0].mxu0 %v2171_v2  ;;  %537 = vmatmul.mubr.bf16.vlgmr.msra.gmra.mrb[0].mxu1 %v2171_v2 }
  0x37   :  { %546 = vmatpush1.bf16.msra.mxu0 %v1598_v5  ;;  %577 = vmatprep.mubr.bf16.mxu0 %v2021_v0  ;;  %v1648_v5 = vcombine.low %v88_v56, %v92_v57  ;;  %v1868_v56 = vld [vmem:[#allocation2 + $0xf0] ss:$8 sps:$4 sm:$0xff]   ;;  %v1876_v57 = vld [vmem:[#allocation2 + $0x104] ss:$8 sps:$4 sm:$0xff]  }
  0x38   :  { %547 = vmatprep.subr.bf16.mxu0 %v1607_v7  ;;  %587 = vmatpush1.bf16.msra.mxu1 %v1600_v26  ;;  %v1657_v7 = vcombine.high %v96_v62, %v100_v63  ;;  %v1819_v26 = vld [vmem:[#allocation2 + $0x54] ss:$8 sps:$4 sm:$0xff]   ;;  %v1907_v62 = vld [vmem:[#allocation2 + $0x2d0] ss:$8 sps:$4 sm:$0xff]  }
  0x39   :  { %618 = vmatprep.mubr.bf16.mxu1 %v2021_v0  ;;  %588 = vmatprep.subr.bf16.mxu1 %v1609_v27  ;;  %v68_v0 = vld [vmem:[%s2316_s1 + $0xf8] sm:$0xff] }
  0x3a   :  { %v1625_v44 = vcombine.high %v64_v39, %v68_v0  ;;  %v1624_v49 = vcombine.low %v64_v39, %v68_v0  ;;  %v1817_v27 = vld [vmem:[#allocation2 + $0x50] ss:$8 sps:$4 sm:$0xff]   ;;  %v1867_v39 = vld [vmem:[#allocation2 + $0x264] ss:$8 sps:$4 sm:$0xff]   ;;  %v1865_v0 = vld [vmem:[#allocation2 + $0x260] ss:$8 sps:$4 sm:$0xff]  }
  0x3b   :  { %548 = vmatpush1.bf16.msra.mxu0 %v1606_v13  ;;  %v1802_v13 = vld [vmem:[#allocation2] ss:$8 sps:$4 sm:$0xff]   ;;  %v1909_v63 = vld [vmem:[#allocation2 + $0x2d4] ss:$8 sps:$4 sm:$0xff]  }
  0x3c   :  { %549 = vmatprep.subr.bf16.mxu0 %v1615_v15  ;;  %589 = vmatpush1.bf16.msra.mxu1 %v1608_v34  ;;  %v1847_v15 = vld [vmem:[#allocation2 + $0x230] ss:$8 sps:$4 sm:$0xff]   ;;  %v1834_v34 = vld [vmem:[#allocation2 + $0x94] ss:$8 sps:$4 sm:$0xff]  }
  0x3d   :  { %590 = vmatprep.subr.bf16.mxu1 %v1617_v35  ;;  %v1832_v35 = vld [vmem:[#allocation2 + $0x90] ss:$8 sps:$4 sm:$0xff]  }
  0x3f   :  { %550 = vmatpush1.bf16.msra.mxu0 %v1614_v21  ;;  %v1808_v21 = vld [vmem:[#allocation2 + $0x20] ss:$8 sps:$4 sm:$0xff]  }
  0x40   :  { %551 = vmatprep.subr.bf16.mxu0 %v1623_v23  ;;  %591 = vmatpush1.bf16.msra.mxu1 %v1616_v41  ;;  %v1859_v23 = vld [vmem:[#allocation2 + $0x250] ss:$8 sps:$4 sm:$0xff]   ;;  %v1852_v41 = vld [vmem:[#allocation2 + $0xc4] ss:$8 sps:$4 sm:$0xff]  }
  0x41   :  { %592 = vmatprep.subr.bf16.mxu1 %v1625_v44  ;;  %v1850_v44 = vld [vmem:[#allocation2 + $0xc0] ss:$8 sps:$4 sm:$0xff]  }
  0x43   :  { %552 = vmatpush1.bf16.msra.mxu0 %v1622_v29  ;;  %v1820_v29 = vld [vmem:[#allocation2 + $0x60] ss:$8 sps:$4 sm:$0xff]  }
  0x44   :  { %553 = vmatprep.subr.bf16.mxu0 %v1631_v31  ;;  %593 = vmatpush1.bf16.msra.mxu1 %v1624_v49  ;;  %v1823_v31 = vld [vmem:[#allocation2 + $0x70] ss:$8 sps:$4 sm:$0xff]   ;;  %v1864_v49 = vld [vmem:[#allocation2 + $0xe4] ss:$8 sps:$4 sm:$0xff]  }
  0x45   :  { %594 = vmatprep.subr.bf16.mxu1 %v1633_v52  ;;  %v1862_v52 = vld [vmem:[#allocation2 + $0xe0] ss:$8 sps:$4 sm:$0xff]  }
  0x47   :  { %554 = vmatpush1.bf16.msra.mxu0 %v1630_v36  ;;  %v1840_v36 = vld [vmem:[#allocation2 + $0xa4] ss:$8 sps:$4 sm:$0xff]  }
  0x48   :  { %555 = vmatprep.subr.bf16.mxu0 %v1639_v40  ;;  %595 = vmatpush1.bf16.msra.mxu1 %v1632_v55  ;;  %v1844_v40 = vld [vmem:[#allocation2 + $0xb0] ss:$8 sps:$4 sm:$0xff]   ;;  %v1891_v55 = vld [vmem:[#allocation2 + $0x2a4] ss:$8 sps:$4 sm:$0xff]  }
  0x49   :  { %596 = vmatprep.subr.bf16.mxu1 %v1641_v58  ;;  %v1895_v58 = vld [vmem:[#allocation2 + $0x2b0] ss:$8 sps:$4 sm:$0xff]  }
  0x4b   :  { %556 = vmatpush1.bf16.msra.mxu0 %v1638_v45  ;;  %v1858_v45 = vld [vmem:[#allocation2 + $0xd4] ss:$8 sps:$4 sm:$0xff]  }
  0x4c   :  { %557 = vmatprep.subr.bf16.mxu0 %v1647_v48  ;;  %597 = vmatpush1.bf16.msra.mxu1 %v1640_v61  ;;  %v1856_v48 = vld [vmem:[#allocation2 + $0xd0] ss:$8 sps:$4 sm:$0xff]   ;;  %v1903_v61 = vld [vmem:[#allocation2 + $0x2c4] ss:$8 sps:$4 sm:$0xff]  }
  0x4d   :  { %598 = vmatprep.subr.bf16.mxu1 %v1649_v3  ;;  %v1913_v3 = vld [vmem:[#allocation2 + $0x2e0] ss:$8 sps:$4 sm:$0xff]  }
  0x4f   :  { %558 = vmatpush1.bf16.msra.mxu0 %v1646_v53  ;;  %v1870_v53 = vld [vmem:[#allocation2 + $0xf4] ss:$8 sps:$4 sm:$0xff]  }
  0x50   :  { %559 = vmatprep.subr.bf16.mxu0 %v1655_v54  ;;  %599 = vmatpush1.bf16.msra.mxu1 %v1648_v5  ;;  %v1889_v54 = vld [vmem:[#allocation2 + $0x2a0] ss:$8 sps:$4 sm:$0xff]   ;;  %v1919_v5 = vld [vmem:[#allocation2 + $0x2f0] ss:$8 sps:$4 sm:$0xff]  }
  0x51   :  { %600 = vmatprep.subr.bf16.mxu1 %v1657_v7  ;;  %v103_v7 = vlaneseq }
  0x53   :  { %560 = vmatpush1.bf16.msra.mxu0 %v1654_v60  ;;  %v1901_v60 = vld [vmem:[#allocation2 + $0x2c0] ss:$8 sps:$4 sm:$0xff]  }
  0x54   :  { %1505 = vmatprep.subr.bf16.mxu0 %v1831_v59  ;;  %601 = vmatpush1.bf16.msra.mxu1 %v1656_v10  ;;  %v1897_v59 = vld [vmem:[#allocation2 + $0x2b4] ss:$8 sps:$4 sm:$0xff]   ;;  %v2275_v10 = vld [vmem:[%s2317_s2] sm:$0xff] }
  0x55   :  { %1423 = vmatprep.subr.bf16.mxu1 %v1804_v9 }
  0x56   :  { %578 = vmatmul.mubr.bf16.vlgmr.msra.gmra.mrb[4].mxu0 %v2171_v2 }
  0x57   :  { %1506 = vmatpush1.bf16.msra.mxu0 %v1829_v1  ;;  %619 = vmatmul.mubr.bf16.vlgmr.msra.gmra.mrb[4].mxu1 %v2171_v2  ;;  %v1816_v2 = vld [vmem:[#allocation2 + $0x44] ss:$8 sps:$4 sm:$0xff]  }
  0x58   :  { %1507 = vmatprep.subr.bf16.mxu0 %v1837_v4  ;;  %1424 = vmatpush1.bf16.msra.mxu1 %v1802_v13  ;;  %v1915_v1 = vld [vmem:[#allocation2 + $0x2e4] ss:$8 sps:$4 sm:$0xff]   ;;  %v1921_v4 = vld [vmem:[#allocation2 + $0x2f4] ss:$8 sps:$4 sm:$0xff]  }
  0x59   :  { %1425 = vmatprep.subr.bf16.mxu1 %v1807_v14 }
  0x5b   :  { %1508 = vmatpush1.bf16.msra.mxu0 %v1835_v6  ;;  %v1927_v6 = vld [vmem:[#allocation2 + $0x304] ss:$8 sps:$4 sm:$0xff]  }
  0x5c   :  { %1509 = vmatprep.subr.bf16.mxu0 %v1843_v8  ;;  %1426 = vmatpush1.bf16.msra.mxu1 %v1805_v17  ;;  %v2269_v8 = vshrl.u32 %v103_v7, 7 }
  0x5d   :  { %1427 = vmatprep.subr.bf16.mxu1 %v1810_v18 }
  0x5e   :  { %v105_v9 = vsub.s32 0, %v2269_v8 }
  0x5f   :  { %1510 = vmatpush1.bf16.msra.mxu0 %v1841_v11  ;;  %v109_v11 = vsub.s32 1, %v2269_v8 }
  0x60   :  { %1511 = vmatprep.subr.bf16.mxu0 %v1849_v12  ;;  %1428 = vmatpush1.bf16.msra.mxu1 %v1808_v21  ;;  %v106_v12 = vrot.slane %v2275_v10, %v105_v9 }
  0x61   :  { %1429 = vmatprep.subr.bf16.mxu1 %v1813_v22  ;;  %v110_v13 = vrot.slane %v2275_v10, %v109_v11  ;;  %v117_v22 = vsub.s32 3, %v2269_v8 }
  0x63   :  { %1512 = vmatpush1.bf16.msra.mxu0 %v1847_v15 }
  0x64   :  { %1513 = vmatprep.subr.bf16.mxu0 %v1855_v16  ;;  %1430 = vmatpush1.bf16.msra.mxu1 %v1811_v24 }
  0x65   :  { %1431 = vmatprep.subr.bf16.mxu1 %v1816_v2  ;;  %v1874_v2 = vld [vmem:[#allocation2 + $0x100] ss:$8 sps:$4 sm:$0xff]  }
  0x67   :  { %1514 = vmatpush1.bf16.msra.mxu0 %v1853_v19 }
  0x68   :  { %1515 = vmatprep.subr.bf16.mxu0 %v1861_v20  ;;  %1432 = vmatpush1.bf16.msra.mxu1 %v1814_v25  ;;  %v1882_v25 = vld [vmem:[#allocation2 + $0x114] ss:$8 sps:$4 sm:$0xff]  }
  0x69   :  { %1433 = vmatprep.subr.bf16.mxu1 %v1819_v26  ;;  %v118_v26 = vrot.slane %v2275_v10, %v117_v22  ;;  %v1945_v22 = vld [vmem:[#allocation2 + $0x334] ss:$8 sps:$4 sm:$0xff]  }
  0x6b   :  { %1516 = vmatpush1.bf16.msra.mxu0 %v1859_v23 }
  0x6c   :  { %1434 = vmatpush1.bf16.msra.mxu1 %v1817_v27  ;;  %1517 = vmatprep.subr.bf16.mxu0 %v1867_v39  ;;  %v1880_v27 = vld [vmem:[#allocation2 + $0x110] ss:$8 sps:$4 sm:$0xff]   ;;  %v1900_v39 = vld [vmem:[#allocation2 + $0x144] ss:$8 sps:$4 sm:$0xff]  }
  0x6d   :  { %1435 = vmatprep.subr.bf16.mxu1 %v1822_v28 }
  0x6f   :  { %1518 = vmatpush1.bf16.msra.mxu0 %v1865_v0  ;;  %v1898_v0 = vld [vmem:[#allocation2 + $0x140] ss:$8 sps:$4 sm:$0xff]  }
  0x70   :  { %1436 = vmatpush1.bf16.msra.mxu1 %v1820_v29  ;;  %1519 = vmatprep.subr.bf16.mxu0 %v1873_v42  ;;  %v1888_v29 = vld [vmem:[#allocation2 + $0x124] ss:$8 sps:$4 sm:$0xff]   ;;  %v1904_v42 = vld [vmem:[#allocation2 + $0x150] ss:$8 sps:$4 sm:$0xff]  }
  0x71   :  { %1437 = vmatprep.subr.bf16.mxu1 %v1825_v30 }
  0x73   :  { %1520 = vmatpush1.bf16.msra.mxu0 %v1871_v43  ;;  %v125_v43 = vsub.s32 5, %v2269_v8 }
  0x74   :  { %1438 = vmatpush1.bf16.msra.mxu1 %v1823_v31  ;;  %1521 = vmatprep.subr.bf16.mxu0 %v1879_v46  ;;  %v1910_v46 = vld [vmem:[#allocation2 + $0x160] ss:$8 sps:$4 sm:$0xff]  }
  0x75   :  { %1439 = vmatprep.subr.bf16.mxu1 %v1828_v32 }
  0x77   :  { %1522 = vmatpush1.bf16.msra.mxu0 %v1877_v47  ;;  %v126_v47 = vrot.slane %v2275_v10, %v125_v43  ;;  %v1964_v43 = vld [vmem:[#allocation2 + $0x1f0] ss:$8 sps:$4 sm:$0xff]  }
  0x78   :  { %1440 = vmatpush1.bf16.msra.mxu1 %v1826_v33  ;;  %1523 = vmatprep.subr.bf16.mxu0 %v1885_v51 }
  0x79   :  { %1441 = vmatprep.subr.bf16.mxu1 %v1834_v34  ;;  %v1886_v34 = vld [vmem:[#allocation2 + $0x120] ss:$8 sps:$4 sm:$0xff]  }
  0x7b   :  { %1524 = vmatpush1.bf16.msra.mxu0 %v1883_v50 }
  0x7c   :  { %1442 = vmatpush1.bf16.msra.mxu1 %v1832_v35  ;;  %1525 = vmatprep.subr.bf16.mxu0 %v1891_v55 }
  0x7d   :  { %1443 = vmatprep.subr.bf16.mxu1 %v1840_v36  ;;  %v1894_v36 = vld [vmem:[#allocation2 + $0x134] ss:$8 sps:$4 sm:$0xff]  }
  0x7f   :  { %1526 = vmatpush1.bf16.msra.mxu0 %v1889_v54  ;;  %v1916_v54 = vld [vmem:[#allocation2 + $0x170] ss:$8 sps:$4 sm:$0xff]  }
  0x80   :  { %1444 = vmatpush1.bf16.msra.mxu1 %v1838_v37  ;;  %1527 = vmatprep.subr.bf16.mxu0 %v1897_v59  ;;  %v133_v59 = vsub.s32 7, %v2269_v8 }
  0x81   :  { %1445 = vmatprep.subr.bf16.mxu1 %v1846_v38  ;;  %v1892_v38 = vld [vmem:[#allocation2 + $0x130] ss:$8 sps:$4 sm:$0xff]  }
  0x83   :  { %1528 = vmatpush1.bf16.msra.mxu0 %v1895_v58 }
  0x84   :  { %1446 = vmatpush1.bf16.msra.mxu1 %v1844_v40  ;;  %1529 = vmatprep.subr.bf16.mxu0 %v1903_v61  ;;  %v1906_v40 = vld [vmem:[#allocation2 + $0x154] ss:$8 sps:$4 sm:$0xff]   ;;  %v1922_v61 = vld [vmem:[#allocation2 + $0x180] ss:$8 sps:$4 sm:$0xff]  }
  0x85   :  { %1447 = vmatprep.subr.bf16.mxu1 %v1852_v41  ;;  %v121_v41 = vsub.s32 4, %v2269_v8 }
  0x87   :  { %1530 = vmatpush1.bf16.msra.mxu0 %v1901_v60 }
  0x88   :  { %1448 = vmatpush1.bf16.msra.mxu1 %v1850_v44  ;;  %1531 = vmatprep.subr.bf16.mxu0 %v1909_v63  ;;  %v1912_v44 = vld [vmem:[#allocation2 + $0x164] ss:$8 sps:$4 sm:$0xff]  }
  0x89   :  { %1449 = vmatprep.subr.bf16.mxu1 %v1858_v45  ;;  %v122_v45 = vrot.slane %v2275_v10, %v121_v41  ;;  %v1969_v41 = vld [vmem:[#allocation2 + $0x374] ss:$8 sps:$4 sm:$0xff]  }
  0x8b   :  { %1532 = vmatpush1.bf16.msra.mxu0 %v1907_v62  ;;  %v1925_v62 = vld [vmem:[#allocation2 + $0x300] ss:$8 sps:$4 sm:$0xff]  }
  0x8c   :  { %1450 = vmatpush1.bf16.msra.mxu1 %v1856_v48  ;;  %1533 = vmatprep.subr.bf16.mxu0 %v1915_v1  ;;  %v1918_v48 = vld [vmem:[#allocation2 + $0x174] ss:$8 sps:$4 sm:$0xff]  }
  0x8d   :  { %1451 = vmatprep.subr.bf16.mxu1 %v1864_v49  ;;  %v1930_v1 = vld [vmem:[#allocation2 + $0x194] ss:$8 sps:$4 sm:$0xff]  }
  0x8f   :  { %1534 = vmatpush1.bf16.msra.mxu0 %v1913_v3  ;;  %v1933_v3 = vld [vmem:[#allocation2 + $0x314] ss:$8 sps:$4 sm:$0xff]  }
  0x90   :  { %1452 = vmatpush1.bf16.msra.mxu1 %v1862_v52  ;;  %1535 = vmatprep.subr.bf16.mxu0 %v1921_v4  ;;  %v134_v4 = vrot.slane %v2275_v10, %v133_v59  ;;  %v1990_v59 = vld [vmem:[#allocation2 + $0x3e4] ss:$8 sps:$4 sm:$0xff]  }
  0x91   :  { %1453 = vmatprep.subr.bf16.mxu1 %v1870_v53 }
  0x93   :  { %1536 = vmatpush1.bf16.msra.mxu0 %v1919_v5  ;;  %v1928_v5 = vld [vmem:[#allocation2 + $0x190] ss:$8 sps:$4 sm:$0xff]  }
  0x94   :  { %1454 = vmatpush1.bf16.msra.mxu1 %v1868_v56  ;;  %1546 = vmatprep.subr.bf16.mxu0 %v1927_v6  ;;  %v1931_v6 = vld [vmem:[#allocation2 + $0x310] ss:$8 sps:$4 sm:$0xff]  }
  0x95   :  { %1464 = vmatprep.subr.bf16.mxu1 %v1876_v57  ;;  %v1924_v57 = vld [vmem:[#allocation2 + $0x184] ss:$8 sps:$4 sm:$0xff]  }
 0x109   :  { %v497_v14 = vpop.f32.mrb[0].mxu0  ;;  %v2286_v28 = vpop.f32.mrb[0].mxu1 }
 0x10a   :  { %v498_v15 = vadd.f32 %v497_v14, %v106_v12  ;;  %v499_v16 = vpop.f32.mrb[1].mxu0  ;;  %v540_v30 = vpop.f32.mrb[1].mxu1  ;;  %v1936_v12 = vld [vmem:[#allocation2 + $0x1a4] ss:$8 sps:$4 sm:$0xff]  }
 0x10b   :  { %v500_v17 = vadd.f32 %v499_v16, %v110_v13  ;;  %v501_v18 = vpop.f32.mrb[2].mxu0  ;;  %v541_v31 = vadd.f32 %v540_v30, %v118_v26  ;;  %v542_v32 = vpop.f32.mrb[2].mxu1  ;;  %v1939_v13 = vld [vmem:[#allocation2 + $0x324] ss:$8 sps:$4 sm:$0xff]   ;;  %v1949_v30 = vld [vmem:[#allocation2 + $0x340] ss:$8 sps:$4 sm:$0xff]  }
 0x10c   :  { %v627_v19 = vmax.f32 %v498_v15, 0.0  ;;  %v502_v20 = vpop.f32.mrb[3].mxu0  ;;  %v543_v33 = vpop.f32.mrb[3].mxu1  ;;  %v1934_v18 = vld [vmem:[#allocation2 + $0x1a0] ss:$8 sps:$4 sm:$0xff]  }
 0x10d   :  { %v628_v21 = vmax.f32 %v500_v17, 0.0  ;;  %v630_v35 = vmax.f32 %v541_v31, 0.0  ;;  %v1951_v26 = vld [vmem:[#allocation2 + $0x344] ss:$8 sps:$4 sm:$0xff]   ;;  %v1954_v31 = vld [vmem:[#allocation2 + $0x1d4] ss:$8 sps:$4 sm:$0xff]  }
 0x10e   :  { %v635_v23 = vpack.c.bf16 %v627_v19, %v627_v19  ;;  %v1937_v19 = vld [vmem:[#allocation2 + $0x320] ss:$8 sps:$4 sm:$0xff]   ;;  %v1957_v32 = vld [vmem:[#allocation2 + $0x354] ss:$8 sps:$4 sm:$0xff]  }
 0x10f   :  { %v636_v24 = vpack.c.bf16 %v628_v21, %v628_v21  ;;  %v638_v37 = vpack.c.bf16 %v630_v35, %v630_v35  ;;  %v1942_v21 = vld [vmem:[#allocation2 + $0x1b4] ss:$8 sps:$4 sm:$0xff]   ;;  %v1955_v35 = vld [vmem:[#allocation2 + $0x350] ss:$8 sps:$4 sm:$0xff]  }
 0x111   :  { %1455 = vmatprep.mubr.bf16.mxu1 %v636_v24  ;;  %v1940_v24 = vld [vmem:[#allocation2 + $0x1b0] ss:$8 sps:$4 sm:$0xff]  }
 0x112   :  { %1456 = vmatmul.mubr.bf16.vlgmr.msra.gmra.mrb[8].mxu1 %v635_v23 }
 0x113   :  { %1465 = vmatpush1.bf16.msra.mxu1 %v1874_v2  ;;  %1496 = vmatprep.mubr.bf16.mxu1 %v638_v37  ;;  %v1943_v2 = vld [vmem:[#allocation2 + $0x330] ss:$8 sps:$4 sm:$0xff]   ;;  %v1963_v37 = vld [vmem:[#allocation2 + $0x364] ss:$8 sps:$4 sm:$0xff]  }
 0x114   :  { %1466 = vmatprep.subr.bf16.mxu1 %v1882_v25  ;;  %v1948_v25 = vld [vmem:[#allocation2 + $0x1c4] ss:$8 sps:$4 sm:$0xff]  }
 0x117   :  { %1467 = vmatpush1.bf16.msra.mxu1 %v1880_v27  ;;  %v113_v27 = vsub.s32 2, %v2269_v8 }
 0x118   :  { %1468 = vmatprep.subr.bf16.mxu1 %v1888_v29  ;;  %v1946_v29 = vld [vmem:[#allocation2 + $0x1c0] ss:$8 sps:$4 sm:$0xff]  }
 0x119   :  { %v114_v33 = vrot.slane %v2275_v10, %v113_v27 }
 0x11b   :  { %1469 = vmatpush1.bf16.msra.mxu1 %v1886_v34  ;;  %v1952_v34 = vld [vmem:[#allocation2 + $0x1d0] ss:$8 sps:$4 sm:$0xff]  }
 0x11c   :  { %1470 = vmatprep.subr.bf16.mxu1 %v1894_v36  ;;  %v1960_v36 = vld [vmem:[#allocation2 + $0x1e4] ss:$8 sps:$4 sm:$0xff]  }
 0x11f   :  { %1471 = vmatpush1.bf16.msra.mxu1 %v1892_v38  ;;  %v539_v38 = vadd.f32 %v2286_v28, %v114_v33  ;;  %v1970_v28 = vld [vmem:[#allocation2 + $0x380] ss:$8 sps:$4 sm:$0xff]  }
 0x120   :  { %1472 = vmatprep.subr.bf16.mxu1 %v1900_v39  ;;  %v1958_v39 = vld [vmem:[#allocation2 + $0x1e0] ss:$8 sps:$4 sm:$0xff]  }
 0x123   :  { %1473 = vmatpush1.bf16.msra.mxu1 %v1898_v0  ;;  %v1961_v0 = vld [vmem:[#allocation2 + $0x360] ss:$8 sps:$4 sm:$0xff]  }
 0x124   :  { %1474 = vmatprep.subr.bf16.mxu1 %v1906_v40  ;;  %v1966_v40 = vld [vmem:[#allocation2 + $0x1f4] ss:$8 sps:$4 sm:$0xff]  }
 0x127   :  { %1475 = vmatpush1.bf16.msra.mxu1 %v1904_v42  ;;  %v629_v42 = vmax.f32 %v539_v38, 0.0 }
 0x128   :  { %1476 = vmatprep.subr.bf16.mxu1 %v1912_v44  ;;  %v1967_v44 = vld [vmem:[#allocation2 + $0x370] ss:$8 sps:$4 sm:$0xff]  }
 0x129   :  { %v579_v49 = vpop.f32.mrb[4].mxu0 }
 0x12a   :  { %v580_v50 = vadd.f32 %v579_v49, %v122_v45  ;;  %v581_v51 = vpop.f32.mrb[5].mxu0  ;;  %v2294_v7 = vpop.f32.mrb[4].mxu1  ;;  %v1972_v45 = vld [vmem:[#allocation2 + $0x384] ss:$8 sps:$4 sm:$0xff]  }
 0x12b   :  { %v582_v52 = vadd.f32 %v581_v51, %v126_v47  ;;  %1477 = vmatpush1.bf16.msra.mxu1 %v1910_v46  ;;  %v583_v53 = vpop.f32.mrb[6].mxu0  ;;  %v622_v14 = vpop.f32.mrb[5].mxu1  ;;  %v637_v46 = vpack.c.bf16 %v629_v42, %v629_v42  ;;  %v1975_v47 = vld [vmem:[#allocation2 + $0x394] ss:$8 sps:$4 sm:$0xff]   ;;  %v1978_v49 = vld [vmem:[#allocation2 + $0x3a4] ss:$8 sps:$4 sm:$0xff]  }
 0x12c   :  { %v631_v55 = vmax.f32 %v580_v50, 0.0  ;;  %v584_v56 = vpop.f32.mrb[7].mxu0  ;;  %1478 = vmatprep.subr.bf16.mxu1 %v1918_v48  ;;  %v623_v15 = vadd.f32 %v622_v14, %v134_v4  ;;  %v624_v16 = vpop.f32.mrb[6].mxu1  ;;  %v1973_v48 = vld [vmem:[#allocation2 + $0x390] ss:$8 sps:$4 sm:$0xff]  }
 0x12d   :  { %v632_v58 = vmax.f32 %v582_v52, 0.0  ;;  %v625_v17 = vpop.f32.mrb[7].mxu1  ;;  %v1976_v50 = vld [vmem:[#allocation2 + $0x3a0] ss:$8 sps:$4 sm:$0xff]   ;;  %v1981_v51 = vld [vmem:[#allocation2 + $0x3b4] ss:$8 sps:$4 sm:$0xff]  }
 0x12e   :  { %v639_v63 = vpack.c.bf16 %v631_v55, %v631_v55  ;;  %v634_v20 = vmax.f32 %v623_v15, 0.0  ;;  %v1979_v52 = vld [vmem:[#allocation2 + $0x3b0] ss:$8 sps:$4 sm:$0xff]   ;;  %v1984_v53 = vld [vmem:[#allocation2 + $0x3c4] ss:$8 sps:$4 sm:$0xff]   ;;  %v129_v55 = vsub.s32 6, %v2269_v8 }
 0x12f   :  { %v640_v60 = vpack.c.bf16 %v632_v58, %v632_v58  ;;  %1479 = vmatpush1.bf16.msra.mxu1 %v1916_v54  ;;  %v1982_v54 = vld [vmem:[#allocation2 + $0x3c0] ss:$8 sps:$4 sm:$0xff]   ;;  %v1987_v56 = vld [vmem:[#allocation2 + $0x3d4] ss:$8 sps:$4 sm:$0xff]  }
 0x130   :  { %1480 = vmatprep.subr.bf16.mxu1 %v1924_v57  ;;  %v642_v23 = vpack.c.bf16 %v634_v20, %v634_v20  ;;  %v1985_v57 = vld [vmem:[#allocation2 + $0x3d0] ss:$8 sps:$4 sm:$0xff]   ;;  %v130_v58 = vrot.slane %v2275_v10, %v129_v55  ;;  %v771_v10 = vld [vmem:[%s2319_s4] sm:$0x3] }
 0x131   :  { %1537 = vmatprep.mubr.bf16.mxu0 %v640_v60  ;;  %v1988_v60 = vld [vmem:[#allocation2 + $0x3e0] ss:$8 sps:$4 sm:$0xff]  }
 0x132   :  { %1538 = vmatmul.mubr.bf16.vlgmr.msra.gmra.mrb[8].mxu0 %v639_v63  ;;  %v1991_v63 = vld [vmem:[#allocation2 + $0x3f0] ss:$8 sps:$4 sm:$0xff]  }
 0x133   :  { %1481 = vmatpush1.bf16.msra.mxu1 %v1922_v61  ;;  %1547 = vmatpush1.bf16.msra.mxu0 %v1925_v62  ;;  %v621_v61 = vadd.f32 %v2294_v7, %v130_v58  ;;  %v1993_v62 = vld [vmem:[#allocation2 + $0x3f4] ss:$8 sps:$4 sm:$0xff]   ;;  %v776_v7 = vrot.slane %v771_v10, %v105_v9 }
 0x134   :  { %1482 = vmatprep.subr.bf16.mxu1 %v1930_v1  ;;  %1548 = vmatprep.subr.bf16.mxu0 %v1933_v3 }
 0x135   :  { %1578 = vmatprep.mubr.bf16.mxu0 %v642_v23  ;;  %v633_v1 = vmax.f32 %v621_v61, 0.0 }
 0x137   :  { %1483 = vmatpush1.bf16.msra.mxu1 %v1928_v5  ;;  %1549 = vmatpush1.bf16.msra.mxu0 %v1931_v6  ;;  %v641_v3 = vpack.c.bf16 %v633_v1, %v633_v1 }
 0x138   :  { %1484 = vmatprep.subr.bf16.mxu1 %v1936_v12  ;;  %1550 = vmatprep.subr.bf16.mxu0 %v1939_v13  ;;  %v780_v13 = vrot.slane %v771_v10, %v109_v11 }
 0x13b   :  { %1485 = vmatpush1.bf16.msra.mxu1 %v1934_v18  ;;  %1551 = vmatpush1.bf16.msra.mxu0 %v1937_v19 }
 0x13c   :  { %1486 = vmatprep.subr.bf16.mxu1 %v1942_v21  ;;  %1552 = vmatprep.subr.bf16.mxu0 %v1945_v22 }
 0x13f   :  { %1487 = vmatpush1.bf16.msra.mxu1 %v1940_v24  ;;  %1553 = vmatpush1.bf16.msra.mxu0 %v1943_v2 }
 0x140   :  { %1488 = vmatprep.subr.bf16.mxu1 %v1948_v25  ;;  %1554 = vmatprep.subr.bf16.mxu0 %v1951_v26 }
 0x143   :  { %1489 = vmatpush1.bf16.msra.mxu1 %v1946_v29  ;;  %1555 = vmatpush1.bf16.msra.mxu0 %v1949_v30 }
 0x144   :  { %1490 = vmatprep.subr.bf16.mxu1 %v1954_v31  ;;  %1556 = vmatprep.subr.bf16.mxu0 %v1957_v32 }
 0x147   :  { %1491 = vmatpush1.bf16.msra.mxu1 %v1952_v34  ;;  %1557 = vmatpush1.bf16.msra.mxu0 %v1955_v35 }
 0x148   :  { %1492 = vmatprep.subr.bf16.mxu1 %v1960_v36  ;;  %1558 = vmatprep.subr.bf16.mxu0 %v1963_v37 }
 0x14b   :  { %1493 = vmatpush1.bf16.msra.mxu1 %v1958_v39  ;;  %1559 = vmatpush1.bf16.msra.mxu0 %v1961_v0 }
 0x14c   :  { %1494 = vmatprep.subr.bf16.mxu1 %v1966_v40  ;;  %1560 = vmatprep.subr.bf16.mxu0 %v1969_v41 }
 0x14f   :  { %1495 = vmatpush1.bf16.msra.mxu1 %v1964_v43  ;;  %1561 = vmatpush1.bf16.msra.mxu0 %v1967_v44 }
 0x150   :  { %1562 = vmatprep.subr.bf16.mxu0 %v1972_v45 }
 0x152   :  { %1497 = vmatmul.mubr.bf16.vlgmr.msra.gmra.mrb[8].mxu1 %v637_v46 }
 0x153   :  { %1563 = vmatpush1.bf16.msra.mxu0 %v1970_v28 }
 0x154   :  { %1564 = vmatprep.subr.bf16.mxu0 %v1975_v47 }
 0x157   :  { %1565 = vmatpush1.bf16.msra.mxu0 %v1973_v48 }
 0x158   :  { %1566 = vmatprep.subr.bf16.mxu0 %v1978_v49 }
 0x15b   :  { %1567 = vmatpush1.bf16.msra.mxu0 %v1976_v50 }
 0x15c   :  { %1568 = vmatprep.subr.bf16.mxu0 %v1981_v51 }
 0x15f   :  { %1569 = vmatpush1.bf16.msra.mxu0 %v1979_v52 }
 0x160   :  { %1570 = vmatprep.subr.bf16.mxu0 %v1984_v53 }
 0x163   :  { %1571 = vmatpush1.bf16.msra.mxu0 %v1982_v54 }
 0x164   :  { %1572 = vmatprep.subr.bf16.mxu0 %v1987_v56 }
 0x167   :  { %1573 = vmatpush1.bf16.msra.mxu0 %v1985_v57 }
 0x168   :  { %1574 = vmatprep.subr.bf16.mxu0 %v1990_v59 }
 0x16b   :  { %1575 = vmatpush1.bf16.msra.mxu0 %v1988_v60 }
 0x16c   :  { %1576 = vmatprep.subr.bf16.mxu0 %v1993_v62 }
 0x16f   :  { %1577 = vmatpush1.bf16.msra.mxu0 %v1991_v63 }
 0x172   :  { %1579 = vmatmul.mubr.bf16.vlgmr.msra.gmra.mrb[8].mxu0 %v641_v3 }
 0x225   :  { %v1498_v4 = vpop.f32.mrb[8].mxu1 }
 0x226   :  { %v1500_v5 = vpop.f32.mrb[9].mxu1  ;;  %v1786_v14 = vadd.f32 %v1498_v4, %v776_v7 }
 0x227   :  { %v1502_v6 = vpop.f32.mrb[10].mxu1  ;;  %v1788_v15 = vadd.f32 %v1500_v5, %v780_v13 }
 0x228   :  { %v1503_v12 = vpop.f32.mrb[11].mxu1 }
 0x245   :  { %v1580_v16 = vpop.f32.mrb[8].mxu0 }
 0x246   :  { %v1787_v17 = vadd.f32 %v1786_v14, %v1580_v16  ;;  %v1582_v18 = vpop.f32.mrb[9].mxu0 }
 0x247   :  { %v1789_v19 = vadd.f32 %v1788_v15, %v1582_v18  ;;  %v1584_v20 = vpop.f32.mrb[10].mxu0 }
 0x248   :  { %1587 = vst [vmem:[%s2320_s5] sm:$0xff] %v1787_v17  ;;  %v1585_v21 = vpop.f32.mrb[11].mxu0 }
 0x249   :  { %1588 = vst [vmem:[%s2320_s5 + $0x8] sm:$0xff] %v1789_v19 }
 0x24a   :  { %1593 = vsyncpa [#allocation3], 1 }

</bundles_post_ra>
